<compile_context>
chip_gen: v6e
topology: v6e:2x2x1
jax: 0.10.0
libtpu: 0.0.40
codegen_flags: <defaults>
</compile_context>

<pallas_src>
import functools

import jax
import jax.numpy as jnp
from jax.experimental import pallas as pl
from jax.experimental.pallas import tpu as pltpu

_EPS = 1e-5


def _round_up(x, m):
    return (x + m - 1) // m * m


# ---------------------------------------------------------------------------
# Kernel 1: strided conv as a single im2col matmul + per-block BN partial stats
# ---------------------------------------------------------------------------
def _conv_stats_kernel(z_ref, w_ref, y_ref, s_ref, q_ref, *, Ho, Wo, C4):
    """One batch element per grid step.

    z_ref : (1, Ho+1, Wo+1, C4)  space-to-depth input block (C4 = 4*Cin)
    w_ref : (4*C4, Cp)           flattened 4x4 conv weights, Cout zero-padded to Cp (Cp%128==0)
    y_ref : (1, Ho*Wo, Cp)       conv output block (lane-dense)
    s_ref : (1, 1, Cp)           per-block per-channel sum        (for BN mean)
    q_ref : (1, 1, Cp)           per-block per-channel sum of x^2 (for BN var)
    """
    z = z_ref[...]
    # im2col of the equivalent 2x2 stride-1 conv: 4 static slices + one lane concat,
    # then a single MXU matmul with K = 4*C4 = 16*Cin.
    p00 = z[:, 0:Ho, 0:Wo, :].reshape(Ho * Wo, C4)
    p01 = z[:, 0:Ho, 1:Wo + 1, :].reshape(Ho * Wo, C4)
    p10 = z[:, 1:Ho + 1, 0:Wo, :].reshape(Ho * Wo, C4)
    p11 = z[:, 1:Ho + 1, 1:Wo + 1, :].reshape(Ho * Wo, C4)
    patch = jnp.concatenate([p00, p01, p10, p11], axis=-1)          # (Ho*Wo, 4*C4)

    y = jnp.dot(patch, w_ref[...], preferred_element_type=jnp.float32)  # (Ho*Wo, Cp)

    y_ref[...] = y[None]
    s_ref[...] = jnp.sum(y, axis=0, keepdims=True)[None]
    q_ref[...] = jnp.sum(y * y, axis=0, keepdims=True)[None]


# ---------------------------------------------------------------------------
# Kernel 2: folded BN affine (scale/shift) + ReLU, fully lane-dense elementwise
# ---------------------------------------------------------------------------
def _affine_relu_kernel(y_ref, s_ref, t_ref, o_ref):
    # y_ref/o_ref: (1, Ho*Wo, Cp);  s_ref/t_ref: (1, 1, Cp)  (per-channel, broadcast)
    o_ref[...] = jnp.maximum(y_ref[...] * s_ref[...] + t_ref[...], 0.0)


# ---------------------------------------------------------------------------
# Wrapper
# ---------------------------------------------------------------------------
def downsample_forward(x_nchw, params, *, is_batchnorm=True,
                       ks=4, stride=2, padding=1,
                       compute_dtype=jnp.float32):
    """Forward pass of Downsample. Input/output are NCHW like PyTorch.

    compute_dtype: set to jnp.bfloat16 on v6e/v7x for peak MXU rate (accumulation stays f32,
                   BN math stays f32); default f32 for exact-reference fidelity.
    """
    assert ks == 4 and stride == 2, "kernel specialised to the module defaults (ks=4, stride=2)"
    w = params["w"]
    N, Cin, H, W = x_nchw.shape
    Cout = w.shape[-1]
    p = padding
    assert (H + 2 * p) % 2 == 0 and (W + 2 * p) % 2 == 0, "H+2p / W+2p must be even"

    Hz, Wz = (H + 2 * p) // 2, (W + 2 * p) // 2       # space-to-depth spatial size
    Ho, Wo = Hz - 1, Wz - 1                           # conv output spatial size
    C4 = 4 * Cin
    Cp = _round_up(Cout, 128)                         # lane-dense channel padding

    # --- layout plumbing (wrapper side): NCHW -> NHWC, pad, space-to-depth -----------------
    x = jnp.transpose(x_nchw, (0, 2, 3, 1)).astype(jnp.float32)
    xp = jnp.pad(x, ((0, 0), (p, p), (p, p), (0, 0)))
    z = xp.reshape(N, Hz, 2, Wz, 2, Cin)
    z = jnp.transpose(z, (0, 1, 3, 2, 4, 5)).reshape(N, Hz, Wz, C4)   # z[n,r,s,(a,b,c)] = xp[n,2r+a,2s+b,c]

    # Rearrange 4x4 weights so the conv is one (rows, 16*Cin) @ (16*Cin, Cp) matmul:
    # W2[dh,dw,(a,b,c),o] = W[2dh+a, 2dw+b, c, o]
    w6 = w.astype(jnp.float32).reshape(2, 2, 2, 2, Cin, Cout)         # (dh, a, dw, b, c, o)
    w6 = jnp.transpose(w6, (0, 2, 1, 3, 4, 5))                        # (dh, dw, a, b, c, o)
    wm = w6.reshape(16 * Cin, Cout)
    wm = jnp.pad(wm, ((0, 0), (0, Cp - Cout)))                        # zero-pad Cout -> Cp

    z = z.astype(compute_dtype)
    wm = wm.astype(compute_dtype)

    # --- kernel 1: conv + partial BN stats, grid over batch ("parallel" for v7x megacore) ---
    kernel1 = functools.partial(_conv_stats_kernel, Ho=Ho, Wo=Wo, C4=C4)
    y, psum, psq = pl.pallas_call(
        kernel1,
        grid=(N,),
        in_specs=[
            pl.BlockSpec((1, Hz, Wz, C4), lambda n: (n, 0, 0, 0)),    # input block per batch elem
            pl.BlockSpec((16 * Cin, Cp), lambda n: (0, 0)),           # weights resident
        ],
        out_specs=[
            pl.BlockSpec((1, Ho * Wo, Cp), lambda n: (n, 0, 0)),
            pl.BlockSpec((1, 1, Cp), lambda n: (n, 0, 0)),
            pl.BlockSpec((1, 1, Cp), lambda n: (n, 0, 0)),
        ],
        out_shape=(
            jax.ShapeDtypeStruct((N, Ho * Wo, Cp), jnp.float32),
            jax.ShapeDtypeStruct((N, 1, Cp), jnp.float32),
            jax.ShapeDtypeStruct((N, 1, Cp), jnp.float32),
        ),
        compiler_params=pltpu.CompilerParams(dimension_semantics=("parallel",)),
    )(z, wm)

    # --- fold BN (train-mode batch stats) into one per-channel scale/shift ------------------
    if is_batchnorm:
        gamma = jnp.pad(params["gamma"].astype(jnp.float32), (0, Cp - Cout))
        beta = jnp.pad(params["beta"].astype(jnp.float32), (0, Cp - Cout))
        cnt = float(N * Ho * Wo)
        mean = jnp.sum(psum, axis=(0, 1)) / cnt
        var = jnp.maximum(jnp.sum(psq, axis=(0, 1)) / cnt - mean * mean, 0.0)   # biased variance
        scale = gamma * jax.lax.rsqrt(var + _EPS)
        shift = beta - mean * scale
        # conv bias cancels exactly under train-mode BN -> intentionally not added.
    else:
        scale = jnp.ones((Cp,), jnp.float32)
        shift = jnp.pad(params["b"].astype(jnp.float32), (0, Cp - Cout))

    # --- kernel 2: lane-dense scale/shift + ReLU ---------------------------------------------
    out_p = pl.pallas_call(
        _affine_relu_kernel,
        grid=(N,),
        in_specs=[
            pl.BlockSpec((1, Ho * Wo, Cp), lambda n: (n, 0, 0)),
            pl.BlockSpec((1, 1, Cp), lambda n: (0, 0, 0)),
            pl.BlockSpec((1, 1, Cp), lambda n: (0, 0, 0)),
        ],
        out_specs=pl.BlockSpec((1, Ho * Wo, Cp), lambda n: (n, 0, 0)),
        out_shape=jax.ShapeDtypeStruct((N, Ho * Wo, Cp), jnp.float32),
        compiler_params=pltpu.CompilerParams(dimension_semantics=("parallel",)),
    )(y, scale.reshape(1, 1, Cp), shift.reshape(1, 1, Cp))

    out = out_p[:, :, :Cout].reshape(N, Ho, Wo, Cout)
    return jnp.transpose(out, (0, 3, 1, 2))                          # -> NCHW


# ---------------------------------------------------------------------------
# Parameter init mirroring the torch module (kaiming fan_in for conv weight,
# torch-default uniform bias, BN gamma ~ N(1, 0.02), beta = 0).
# ---------------------------------------------------------------------------
def init_params(key, in_size, out_size, ks=4):
    k_w, k_b, k_g = jax.random.split(key, 3)
    fan_in = in_size * ks * ks
    w = (2.0 / fan_in) ** 0.5 * jax.random.normal(k_w, (ks, ks, in_size, out_size), jnp.float32)
    bound = 1.0 / fan_in ** 0.5
    b = jax.random.uniform(k_b, (out_size,), jnp.float32, -bound, bound)
    gamma = 1.0 + 0.02 * jax.random.normal(k_g, (out_size,), jnp.float32)
    beta = jnp.zeros((out_size,), jnp.float32)
    return {"w": w, "b": b, "gamma": gamma, "beta": beta}


# ---------------------------------------------------------------------------
# Demo
# ---------------------------------------------------------------------------
if __name__ == "__main__":
    key = jax.random.PRNGKey(0)
    k_x, k_p = jax.random.split(key)

    N, Cin, H, W = 2, 4, 16, 16
    Cout = 8
    x = jax.random.normal(k_x, (N, Cin, H, W), jnp.float32)          # NCHW, like PyTorch
    params = init_params(k_p, in_size=Cin, out_size=Cout)

    out = downsample_forward(x, params, is_batchnorm=True)
    out = jax.block_until_ready(out)

    assert out.shape == (N, Cout, H // 2, W // 2), out.shape
    assert bool(jnp.all(jnp.isfinite(out)))
    print("KERNEL_OK")
</pallas_src>

<mosaic_0001>
module attributes {stable_mosaic.version = 11 : i64} {
  func.func @_conv_stats_kernel(%arg0: i32, %arg1: memref<1x9x9x16xf32, #tpu.memory_space<vmem>>, %arg2: memref<64x128xf32, #tpu.memory_space<vmem>>, %arg3: memref<1x64x128xf32, #tpu.memory_space<vmem>>, %arg4: memref<1x1x128xf32, #tpu.memory_space<vmem>>, %arg5: memref<1x1x128xf32, #tpu.memory_space<vmem>>) attributes {dimension_semantics = [#tpu.dimension_semantics<parallel>], iteration_bounds = array<i64: 2>, scalar_prefetch = 0 : i64, scratch_operands = 0 : i64, tpu.core_type = #tpu.core_type<tc>, window_params = [{transform_indices = @transform_0, window_bounds = array<i64: 1, 9, 9, 16>}, {pipeline_mode = #tpu.pipeline_mode<synchronous>, transform_indices = @transform_1, window_bounds = array<i64: 64, 128>}, {transform_indices = @transform_2, window_bounds = array<i64: 1, 64, 128>}, {transform_indices = @transform_3, window_bounds = array<i64: 1, 1, 128>}, {transform_indices = @transform_4, window_bounds = array<i64: 1, 1, 128>}]} {
    %c0 = arith.constant 0 : index
    %c0_0 = arith.constant 0 : index
    %c0_1 = arith.constant 0 : index
    %c0_2 = arith.constant 0 : index
    %0 = vector.load %arg1[%c0, %c0_0, %c0_1, %c0_2] : memref<1x9x9x16xf32, #tpu.memory_space<vmem>>, vector<1x9x9x16xf32>
    %1 = vector.extract_strided_slice %0 {offsets = [0, 0, 0, 0], sizes = [1, 8, 8, 16], strides = [1, 1, 1, 1]} : vector<1x9x9x16xf32> to vector<1x8x8x16xf32>
    %2 = vector.shape_cast %1 : vector<1x8x8x16xf32> to vector<64x16xf32>
    %3 = vector.extract_strided_slice %0 {offsets = [0, 0, 1, 0], sizes = [1, 8, 8, 16], strides = [1, 1, 1, 1]} : vector<1x9x9x16xf32> to vector<1x8x8x16xf32>
    %4 = vector.shape_cast %3 : vector<1x8x8x16xf32> to vector<64x16xf32>
    %5 = vector.extract_strided_slice %0 {offsets = [0, 1, 0, 0], sizes = [1, 8, 8, 16], strides = [1, 1, 1, 1]} : vector<1x9x9x16xf32> to vector<1x8x8x16xf32>
    %6 = vector.shape_cast %5 : vector<1x8x8x16xf32> to vector<64x16xf32>
    %7 = vector.extract_strided_slice %0 {offsets = [0, 1, 1, 0], sizes = [1, 8, 8, 16], strides = [1, 1, 1, 1]} : vector<1x9x9x16xf32> to vector<1x8x8x16xf32>
    %8 = vector.shape_cast %7 : vector<1x8x8x16xf32> to vector<64x16xf32>
    %9 = tpu.concatenate %2, %4, %6, %8 in 1 : vector<64x16xf32>, vector<64x16xf32>, vector<64x16xf32>, vector<64x16xf32> -> vector<64x64xf32>
    %c0_3 = arith.constant 0 : index
    %c0_4 = arith.constant 0 : index
    %10 = vector.load %arg2[%c0_3, %c0_4] : memref<64x128xf32, #tpu.memory_space<vmem>>, vector<64x128xf32>
    %cst = arith.constant dense<0.000000e+00> : vector<64x128xf32>
    %11 = tpu.matmul %9, %10, %cst {dimension_numbers = #tpu.dot_dimension_numbers<[1], [0], [0], [1], [0, 0, 1, 1], [], []>} : vector<64x64xf32>, vector<64x128xf32>, vector<64x128xf32> -> vector<64x128xf32>
    %12 = vector.shape_cast %11 : vector<64x128xf32> to vector<1x64x128xf32>
    %c0_5 = arith.constant 0 : index
    %c0_6 = arith.constant 0 : index
    %c0_7 = arith.constant 0 : index
    %13 = vector.load %arg3[%c0_5, %c0_6, %c0_7] : memref<1x64x128xf32, #tpu.memory_space<vmem>>, vector<1x64x128xf32>
    tpu.vector_store %arg3[%c0_5, %c0_6, %c0_7], %12 {strides = array<i32>} : memref<1x64x128xf32, #tpu.memory_space<vmem>>, vector<1x64x128xf32>,
    %cst_8 = arith.constant dense<0.000000e+00> : vector<128xf32>
    %14 = vector.multi_reduction <add>, %11, %cst_8 [0] : vector<64x128xf32> to vector<128xf32>
    %15 = vector.shape_cast %14 : vector<128xf32> to vector<1x128xf32>
    %16 = vector.shape_cast %15 : vector<1x128xf32> to vector<1x1x128xf32>
    %c0_9 = arith.constant 0 : index
    %c0_10 = arith.constant 0 : index
    %c0_11 = arith.constant 0 : index
    %17 = vector.load %arg4[%c0_9, %c0_10, %c0_11] : memref<1x1x128xf32, #tpu.memory_space<vmem>>, vector<1x1x128xf32>
    tpu.vector_store %arg4[%c0_9, %c0_10, %c0_11], %16 {strides = array<i32>} : memref<1x1x128xf32, #tpu.memory_space<vmem>>, vector<1x1x128xf32>,
    %18 = arith.mulf %11, %11 : vector<64x128xf32>
    %cst_12 = arith.constant dense<0.000000e+00> : vector<128xf32>
    %19 = vector.multi_reduction <add>, %18, %cst_12 [0] : vector<64x128xf32> to vector<128xf32>
    %20 = vector.shape_cast %19 : vector<128xf32> to vector<1x128xf32>
    %21 = vector.shape_cast %20 : vector<1x128xf32> to vector<1x1x128xf32>
    %c0_13 = arith.constant 0 : index
    %c0_14 = arith.constant 0 : index
    %c0_15 = arith.constant 0 : index
    %22 = vector.load %arg5[%c0_13, %c0_14, %c0_15] : memref<1x1x128xf32, #tpu.memory_space<vmem>>, vector<1x1x128xf32>
    tpu.vector_store %arg5[%c0_13, %c0_14, %c0_15], %21 {strides = array<i32>} : memref<1x1x128xf32, #tpu.memory_space<vmem>>, vector<1x1x128xf32>,
    return
  }
  func.func @transform_0(%arg0: i32) -> (i32, i32, i32, i32) {
    %c0_i32 = arith.constant 0 : i32
    %c0_i32_0 = arith.constant 0 : i32
    %c0_i32_1 = arith.constant 0 : i32
    %c0_i32_2 = arith.constant 0 : i32
    return %arg0, %c0_i32, %c0_i32_0, %c0_i32_1 : i32, i32, i32, i32
  }
  func.func @transform_1(%arg0: i32) -> (i32, i32) {
    %c0_i32 = arith.constant 0 : i32
    %c0_i32_0 = arith.constant 0 : i32
    %c0_i32_1 = arith.constant 0 : i32
    return %c0_i32, %c0_i32_0 : i32, i32
  }
  func.func @transform_2(%arg0: i32) -> (i32, i32, i32) {
    %c0_i32 = arith.constant 0 : i32
    %c0_i32_0 = arith.constant 0 : i32
    %c0_i32_1 = arith.constant 0 : i32
    return %arg0, %c0_i32, %c0_i32_0 : i32, i32, i32
  }
  func.func @transform_3(%arg0: i32) -> (i32, i32, i32) {
    %c0_i32 = arith.constant 0 : i32
    %c0_i32_0 = arith.constant 0 : i32
    %c0_i32_1 = arith.constant 0 : i32
    return %arg0, %c0_i32, %c0_i32_0 : i32, i32, i32
  }
  func.func @transform_4(%arg0: i32) -> (i32, i32, i32) {
    %c0_i32 = arith.constant 0 : i32
    %c0_i32_0 = arith.constant 0 : i32
    %c0_i32_1 = arith.constant 0 : i32
    return %arg0, %c0_i32, %c0_i32_0 : i32, i32, i32
  }
}

</mosaic_0001>

<bundles_post_ra>
// kernel: tpu_custom_call.1
= control target key start
LH: loop header
LB: loop body
LE: loop exit
PB: predicated region body
PF: predicated region fallthrough
CT: control target
= control target key end

     0   :  { %10 = vsyncpa [#allocation3], 0  ;;  %s1342_s0 = inlined_call_operand.vmem [shape: f32[2,9,9,16], index: 0, kind: input, shape index: {}]   ;;  %s1343_s1 = inlined_call_operand.vmem [shape: f32[64,128], index: 1, kind: input, shape index: {}]   ;;  %s1344_s2 = inlined_call_operand.hbm [shape: f32[2,64,128], index: 2, kind: output, shape index: {0}]   ;;  %s1345_s3 = inlined_call_operand.hbm [shape: f32[2,1,128], index: 3, kind: output, shape index: {1}]   ;;  %s1346_s4 = inlined_call_operand.hbm [shape: f32[2,1,128], index: 4, kind: output, shape index: {2}]  }
   0x1   :  { %12 = vsyncpa [#allocation3 + $0x1], 0 }
   0x2   :  { %13 = vsyncpa [#allocation5], 0 }
   0x3   :  { %15 = vsyncpa [#allocation5 + $0x1], 0  ;;  %s1008_s15 = smov 0   ;;  %s1010_s16 = smov 0  }
   0x4   :  { %s1012_s17 = smov 0   ;;  %s1014_s18 = smov 0  }
   0x5 LB: > { %s1029_s19 = sadd.s32 4294967295, %s973_s18   ;;  %s720_s20 = sadd.s32 4294967294, %s973_s18   ;;  %s973_s18 = sphi %s1014_s18, %s1352_s18   ;;  %s969_s17 = sphi %s1012_s17, %s1351_s17   ;;  %s965_s16 = sphi %s1010_s16, %s1350_s16   ;;  %s961_s15 = sphi %s1008_s15, %s1349_s15  }
   0x6   : > { %s1033_s21 = sadd.s32 1, %s973_s18   ;;  %s75_s22 = sadd.s32 1, %s969_s17 }
   0x7   : > { %s72_s23 = ssub.s32 %s973_s18, %s1033_s21  ;;  %p85_p0 = scmp.ne.s32.totalorder %s969_s17, %s965_s16 }
   0x8   : > { %p73_p1 = scmp.eq.s32.totalorder %s72_s23, 0  ;;  %p86_p2 = scmp.eq.s32.totalorder %s1029_s19, 1 }
   0x9   : > { %p91_p3 = scmp.ne.s32.totalorder %s965_s16, %s961_s15  ;;  %p92_p4 = scmp.eq.s32.totalorder %s720_s20, 1 }
   0xa   : > { %s1046_s24 = scalar_select %p73_p1, %s969_s17, %s75_s22  }
   0xb   : > { %p1048_p5 = por %p86_p2, %p85_p0  ;;  %p1052_p6 = por %p92_p4, %p91_p3 }
   0xc   : > { %p723_p7 = scmp.ge.s32.totalorder %s973_s18, 1  ;;  %p173_p8 = scmp.lt.s32.totalorder %s973_s18, 3 }
   0xe   : > { %p174_p9 = pnand %p723_p7, %p173_p8 }
   0xf   : > { %p207_p10 = scmp.lt.s32.totalorder (!%p174_p9), %s1029_s19, 1  ;;  %s975_s28 = smov (!%p174_p9), 32  }
  0x10   : > { %177 = sbr.rel (%p174_p9) target bundleno = 449 (0x1c1), region = 28  ;;  %s1212_s9 = sand.u32 (!%p174_p9), 1, %s965_s16  }
  0x11   : > { %s724_s10 = sshll.u32 (!%p174_p9), %s1212_s9, 6  ;;  %s741_s12 = sshll.u32 (!%p174_p9), %s1029_s19, 10 }
  0x12   : > { %s1215_s11 = scalar_lea.vmem (!%p174_p9), [#allocation2], %s724_s10  ;;  %s1228_s23 = scalar_lea.hbm (!%p174_p9), %s1344_s2, %s741_s12 }
  0x13   : > { %s558_s27 = scalar_lea.sflag (!%p174_p9), [#allocation3], %s1212_s9  ;;  %s978_s29 = smov (!%p174_p9), [#allocation2]  }
  0x14   : > { %s861_s30 = sshll.u32 (!%p174_p9), %s978_s29, 4  ;;  %s862_s30 = int_to_ptr.vmem [resolvable:$false] %s861_s30 }
  0x15   : > { %v382_v0 = vld [vmem:[%s1343_s1 + $0x38] sm:$0xff]  ;;  %v381_v1 = vld [vmem:[%s1343_s1 + $0x30] sm:$0xff]  ;;  %s208_s5 = scalar_select %p207_p10, %s1029_s19, 1  ;;  %v380_v2 = vld [vmem:[%s1343_s1 + $0x28] sm:$0xff]  ;;  %vm246_vm0 = vcmask 1046528   ;;  %vm348_vm1 = vcmask 130048  }
  0x16   : > { %758 = vmatprep.subr.mxu0 %v382_v0  ;;  %786 = vmatprep.subr.mxu1 %v382_v0  ;;  %v379_v3 = vld [vmem:[%s1343_s1 + $0x20] sm:$0xff]  ;;  %v378_v4 = vld [vmem:[%s1343_s1 + $0x18] sm:$0xff]  ;;  %v377_v5 = vld [vmem:[%s1343_s1 + $0x10] sm:$0xff]  ;;  %vm357_vm2 = vcmask 261120   ;;  %vm366_vm3 = vcmask 392192   ;;  %vm383_vm4 = vcmask 523264  }
  0x17   : > { %759 = vmatpush3.msra.mxu0 %v382_v0  ;;  %794 = vmatpush3.msra.mxu1 %v382_v0  ;;  %s802_s8 = smul.u32 144, %s208_s5  ;;  %v376_v21 = vld [vmem:[%s1343_s1 + $0x8] sm:$0xff]  ;;  %s976_s5 = smov 16   ;;  %v375_v23 = vld [vmem:[%s1343_s1] sm:$0xff] }
  0x18   : > { %760 = vmatprep.subr.mxu0 %v381_v1  ;;  %787 = vmatprep.subr.mxu1 %v381_v1 }
  0x19   : > { %761 = vmatpush3.msra.mxu0 %v381_v1  ;;  %795 = vmatpush3.msra.mxu1 %v381_v1  ;;  %s1075_s13 = scalar_lea.vmem %s1342_s0, %s802_s8  ;;  %s977_s8 = smov 48  }
  0x1a   : > { %762 = vmatprep.subr.mxu0 %v380_v2  ;;  %788 = vmatprep.subr.mxu1 %v380_v2  ;;  %v1084_v6 = vld [vmem:[%s1075_s13 + $0x10] sm:$0xff]  ;;  %v1087_v7 = vld [vmem:[%s1075_s13] sm:$0xff]  ;;  %v213_v8 = vld [vmem:[%s1075_s13 + $0x8] sm:$0x1] }
  0x1b   : > { %763 = vmatpush3.msra.mxu0 %v380_v2  ;;  %796 = vmatpush3.msra.mxu1 %v380_v2  ;;  %v250_v9 = vrot.slane %v1084_v6, 1  ;;  %v247_v10 = vrot.slane %v1087_v7, 1  ;;  %v248_v11 = vrot.slane %v213_v8, 1  ;;  %v1095_v12 = vld [vmem:[%s1075_s13 + $0x20] sm:$0xff]  ;;  %v215_v13 = vld [vmem:[%s1075_s13 + $0x18] sm:$0x1] }
  0x1c   : > { %764 = vmatprep.subr.mxu0 %v379_v3  ;;  %789 = vmatprep.subr.mxu1 %v379_v3  ;;  %v253_v14 = vrot.slane %v1095_v12, 1  ;;  %v251_v15 = vrot.slane %v215_v13, 1  ;;  %v217_v16 = vld [vmem:[%s1075_s13 + $0x28] sm:$0x1]  ;;  %v1102_v19 = vld [vmem:[%s1075_s13 + $0x30] sm:$0xff]  ;;  %v1121_v28 = vld [vmem:[%s1075_s13 + $0x40] sm:$0xff] }
  0x1d   : > { %300 = vrot.lane.b32.xlu1 %v1084_v6, %s975_s28  ;;  %765 = vmatpush3.msra.mxu0 %v379_v3  ;;  %v249_v17 = vsel %vm246_vm0, %v247_v10, %v248_v11  ;;  %v254_v18 = vrot.slane %v217_v16, 1  ;;  %v219_v20 = vld [vmem:[%s1075_s13 + $0x38] sm:$0x1]  ;;  %v256_v25 = vrot.slane %v1102_v19, 1  ;;  %v221_v29 = vld [vmem:[%s1075_s13 + $0x48] sm:$0x1] }
  0x1e   : > { %766 = vmatprep.subr.mxu0 %v378_v4  ;;  %797 = vmatpush3.msra.mxu1 %v379_v3  ;;  %v252_v22 = vsel %vm246_vm0, %v250_v9, %v251_v15  ;;  %v257_v26 = vrot.slane %v219_v20, 1  ;;  %v259_v30 = vrot.slane %v1121_v28, 1  ;;  %v260_v31 = vrot.slane %v221_v29, 1  ;;  %v1128_v32 = vld [vmem:[%s1075_s13 + $0x50] sm:$0xff]  ;;  %v223_v33 = vld [vmem:[%s1075_s13 + $0x58] sm:$0x1] }
  0x1f   : > { %767 = vmatpush3.msra.mxu0 %v378_v4  ;;  %790 = vmatprep.subr.mxu1 %v378_v4  ;;  %v255_v24 = vsel %vm246_vm0, %v253_v14, %v254_v18  ;;  %v262_v35 = vrot.slane %v1128_v32, 1  ;;  %v263_v36 = vrot.slane %v223_v33, 1  ;;  %v1141_v38 = vld [vmem:[%s1075_s13 + $0x60] sm:$0xff]  ;;  %v225_v39 = vld [vmem:[%s1075_s13 + $0x68] sm:$0x1]  ;;  %v1148_v42 = vld [vmem:[%s1075_s13 + $0x70] sm:$0xff] }
  0x20   : > { %276 = vrot.lane.b32.xlu0 %v249_v17, %s976_s5  ;;  %768 = vmatprep.subr.mxu0 %v377_v5  ;;  %v258_v27 = vsel %vm246_vm0, %v256_v25, %v257_v26  ;;  %v261_v34 = vsel %vm246_vm0, %v259_v30, %v260_v31  ;;  %v265_v40 = vrot.slane %v1141_v38, 1  ;;  %v266_v41 = vrot.slane %v225_v39, 1  ;;  %v227_v43 = vld [vmem:[%s1075_s13 + $0x78] sm:$0x1]  ;;  %v228_v48 = vld [vmem:[%s1075_s13 + $0x80] sm:$0xff] }
  0x21   : > { %302 = vrot.lane.b32.xlu1 %v1095_v12, %s975_s28  ;;  %769 = vmatpush3.msra.mxu0 %v377_v5  ;;  %v264_v37 = vsel %vm246_vm0, %v262_v35, %v263_v36  ;;  %v268_v45 = vrot.slane %v1148_v42, 1  ;;  %v269_v46 = vrot.slane %v227_v43, 1  ;;  %v229_v49 = vld [vmem:[%s1075_s13 + $0x88] sm:$0x1]  ;;  %v273_v50 = vrot.slane %v228_v48, 1  ;;  %s579_s13 = sshll.u32 %s1215_s11, 4  ;;  %s1230_s13 = int_to_ptr.vmem [resolvable:$true] %s579_s13 }
  0x22   : > { %770 = vmatprep.subr.mxu0 %v376_v21  ;;  %798 = vmatpush3.msra.mxu1 %v378_v4  ;;  %v267_v44 = vsel %vm246_vm0, %v265_v40, %v266_v41  ;;  %v274_v51 = vrot.slane %v229_v49, 1  ;;  %p864_p0 = scmp.lt.s32.totalorder %s1230_s13, %s862_s30 }
  0x23   : > { %771 = vmatpush3.msra.mxu0 %v376_v21  ;;  %791 = vmatprep.subr.mxu1 %v377_v5  ;;  %v270_v47 = vsel %vm246_vm0, %v268_v45, %v269_v46 }
  0x24   : > { %278 = vrot.lane.b32.xlu0 %v252_v22, %s976_s5  ;;  %772 = vmatprep.subr.mxu0 %v375_v23  ;;  %v275_v52 = vsel %vm246_vm0, %v273_v50, %v274_v51 }
  0x25   : > { %326 = vrot.lane.b32.xlu1 %v255_v24, %s977_s8  ;;  %773 = vmatpush3.msra.mxu0 %v375_v23 }
  0x26   : > { %799 = vmatpush3.msra.mxu1 %v377_v5 }
  0x27   : > { %792 = vmatprep.subr.mxu1 %v376_v21 }
  0x28   : > { %324 = vrot.lane.b32.xlu0 %v252_v22, %s977_s8  ;;  %800 = vmatpush3.msra.mxu1 %v376_v21 }
  0x29   : > { %282 = vrot.lane.b32.xlu1 %v258_v27, %s976_s5  ;;  %793 = vmatprep.subr.mxu1 %v375_v23 }
  0x2a   : > { %801 = vmatpush3.msra.mxu1 %v375_v23 }
  0x2c   : > { %280 = vrot.lane.b32.xlu0 %v255_v24, %s976_s5 }
  0x2d   : > { %306 = vrot.lane.b32.xlu1 %v1121_v28, %s975_s28 }
  0x30   : > { %304 = vrot.lane.b32.xlu0 %v1102_v19, %s975_s28 }
  0x31   : > { %330 = vrot.lane.b32.xlu1 %v261_v34, %s977_s8 }
  0x34   : > { %328 = vrot.lane.b32.xlu0 %v258_v27, %s977_s8 }
  0x35   : > { %286 = vrot.lane.b32.xlu1 %v264_v37, %s976_s5 }
  0x38   : > { %284 = vrot.lane.b32.xlu0 %v261_v34, %s976_s5 }
  0x39   : > { %310 = vrot.lane.b32.xlu1 %v1141_v38, %s975_s28 }
  0x3c   : > { %308 = vrot.lane.b32.xlu0 %v1128_v32, %s975_s28 }
  0x3d   : > { %334 = vrot.lane.b32.xlu1 %v267_v44, %s977_s8 }
  0x40   : > { %332 = vrot.lane.b32.xlu0 %v264_v37, %s977_s8 }
  0x41   : > { %290 = vrot.lane.b32.xlu1 %v270_v47, %s976_s5 }
  0x44   : > { %288 = vrot.lane.b32.xlu0 %v267_v44, %s976_s5  ;;  %s863_s5 = scalar_lea.vmem %s862_s30, 2048 }
  0x45   : > { %314 = vrot.lane.b32.xlu1 %v228_v48, %s975_s28 }
  0x48   : > { %312 = vrot.lane.b32.xlu0 %v1148_v42, %s975_s28  ;;  %s857_s28 = scalar_lea.vmem %s1230_s13, 1024 }
  0x49   : > { %338 = vrot.lane.b32.xlu1 %v275_v52, %s977_s8  ;;  %p858_p11 = scmp.ne.s32.totalorder %s1230_s13, %s857_s28  ;;  %p865_p1 = scmp.lt.s32.totalorder %s863_s5, %s857_s28 }
  0x4b   : > { %p859_p12 = pnand %p858_p11, %p1048_p5  ;;  %p866_p2 = por %p865_p1, %p864_p0 }
  0x4c   : > { %336 = vrot.lane.b32.xlu0 %v270_v47, %s977_s8 }
  0x4d   : > { %p860_p13 = pneg %p859_p12 }
  0x4f   : > { %p867_p3 = pnand %p866_p2, %p860_p13 }
  0x8f   : > { %v301_v53 = vpop.permute.xlu1 %300 }
  0x92   : > { %v277_v54 = vpop.permute.xlu0 %276 }
  0x93   : > { %v303_v55 = vpop.permute.xlu1 %302  ;;  %v349_v57 = vsel %vm348_vm1, %v1087_v7, %v277_v54 }
  0x94   : > { %v358_v62 = vsel %vm357_vm2, %v349_v57, %v301_v53 }
  0x96   : > { %v279_v56 = vpop.permute.xlu0 %278 }
  0x97   : > { %v350_v58 = vsel %vm348_vm1, %v1084_v6, %v279_v56  ;;  %v327_v59 = vpop.permute.xlu1 %326 }
  0x98   : > { %v359_v60 = vsel %vm357_vm2, %v350_v58, %v303_v55 }
  0x99   : > { %v368_v1 = vsel %vm366_vm3, %v359_v60, %v327_v59 }
  0x9a   : > { %v325_v61 = vpop.permute.xlu0 %324 }
  0x9b   : > { %v283_v63 = vpop.permute.xlu1 %282  ;;  %v367_v0 = vsel %vm366_vm3, %v358_v62, %v325_v61 }
  0x9c   : > { %774 = vmatprep.mubr.msk.f32.mxu0 %vm383_vm4, %v367_v0  ;;  %v352_v6 = vsel %vm348_vm1, %v1102_v19, %v283_v63 }
  0x9d   : > { %775 = vmatmul.mubr.msk.f32.vlgmr.msra.gmra.mxu0 %vm383_vm4, %v368_v1 }
  0x9e   : > { %v281_v2 = vpop.permute.xlu0 %280 }
  0x9f   : > { %v307_v3 = vpop.permute.xlu1 %306  ;;  %v351_v7 = vsel %vm348_vm1, %v1095_v12, %v281_v2 }
  0xa0   : > { %v361_v10 = vsel %vm357_vm2, %v352_v6, %v307_v3 }
  0xa2   : > { %v305_v4 = vpop.permute.xlu0 %304 }
  0xa3   : > { %v331_v5 = vpop.permute.xlu1 %330  ;;  %v360_v8 = vsel %vm357_vm2, %v351_v7, %v305_v4 }
  0xa4   : > { %v370_v14 = vsel %vm366_vm3, %v361_v10, %v331_v5 }
  0xa6   : > { %v329_v9 = vpop.permute.xlu0 %328 }
  0xa7   : > { %v369_v11 = vsel %vm366_vm3, %v360_v8, %v329_v9  ;;  %v287_v13 = vpop.permute.xlu1 %286 }
  0xa8   : > { %777 = vmatprep.mubr.msk.f32.mxu0 %vm383_vm4, %v369_v11  ;;  %v354_v12 = vsel %vm348_vm1, %v1128_v32, %v287_v13 }
  0xa9   : > { %778 = vmatmul.mubr.msk.f32.gmra.mxu0 %vm383_vm4, %v370_v14 }
  0xaa   : > { %v285_v15 = vpop.permute.xlu0 %284 }
  0xab   : > { %v311_v16 = vpop.permute.xlu1 %310  ;;  %v353_v19 = vsel %vm348_vm1, %v1121_v28, %v285_v15 }
  0xac   : > { %v363_v22 = vsel %vm357_vm2, %v354_v12, %v311_v16 }
  0xae   : > { %v309_v17 = vpop.permute.xlu0 %308 }
  0xaf   : > { %v335_v18 = vpop.permute.xlu1 %334  ;;  %v362_v20 = vsel %vm357_vm2, %v353_v19, %v309_v17 }
  0xb0   : > { %v372_v25 = vsel %vm366_vm3, %v363_v22, %v335_v18 }
  0xb2   : > { %v333_v21 = vpop.permute.xlu0 %332 }
  0xb3   : > { %v291_v23 = vpop.permute.xlu1 %290  ;;  %v371_v24 = vsel %vm366_vm3, %v362_v20, %v333_v21 }
  0xb4   : > { %780 = vmatprep.mubr.msk.f32.mxu1 %vm383_vm4, %v371_v24  ;;  %v356_v28 = vsel %vm348_vm1, %v1148_v42, %v291_v23 }
  0xb5   : > { %781 = vmatmul.mubr.msk.f32.vlgmr.msra.gmra.mxu1 %vm383_vm4, %v372_v25 }
  0xb6   : > { %v289_v26 = vpop.permute.xlu0 %288 }
  0xb7   : > { %v315_v27 = vpop.permute.xlu1 %314  ;;  %v355_v30 = vsel %vm348_vm1, %v1141_v38, %v289_v26 }
  0xb8   : > { %v365_v34 = vsel %vm357_vm2, %v356_v28, %v315_v27 }
  0xba   : > { %v313_v29 = vpop.permute.xlu0 %312 }
  0xbb   : > { %v339_v31 = vpop.permute.xlu1 %338  ;;  %v364_v32 = vsel %vm357_vm2, %v355_v30, %v313_v29 }
  0xbc   : > { %v374_v36 = vsel %vm366_vm3, %v365_v34, %v339_v31 }
  0xbe   : > { %v337_v33 = vpop.permute.xlu0 %336 }
  0xbf   : > { %v373_v35 = vsel %vm366_vm3, %v364_v32, %v337_v33 }
  0xc0   : > { %783 = vmatprep.mubr.msk.f32.mxu1 %vm383_vm4, %v373_v35 }
  0xc1   : > { %784 = vmatmul.mubr.msk.f32.gmra.mxu1 %vm383_vm4, %v374_v36 }
 0x15d   : > { %v776_v37 = vpop.f32.mrf.mxu0 }
 0x15e   : > { %514 = vst [vmem:[%s1215_s11 + $0x8] sm:$0xff] %v776_v37  ;;  %v536_v43 = vmul.f32 %v776_v37, %v776_v37 }
 0x15f   : > { %v474_v38 = vpop.f32.mrf.mxu0 }
 0x160   : > { %513 = vst [vmem:[%s1215_s11] sm:$0xff] %v474_v38  ;;  %v535_v41 = vmul.f32 %v474_v38, %v474_v38  ;;  %v521_v44 = vadd.f32 %v776_v37, %v474_v38 }
 0x162   : > { %v543_v47 = vadd.f32 %v536_v43, %v535_v41 }
 0x169   : > { %v779_v39 = vpop.f32.mrf.mxu0 }
 0x16a   : > { %516 = vst [vmem:[%s1215_s11 + $0x18] sm:$0xff] %v779_v39  ;;  %v538_v50 = vmul.f32 %v779_v39, %v779_v39 }
 0x16b   : > { %v484_v40 = vpop.f32.mrf.mxu0 }
 0x16c   : > { %515 = vst [vmem:[%s1215_s11 + $0x10] sm:$0xff] %v484_v40  ;;  %v537_v45 = vmul.f32 %v484_v40, %v484_v40  ;;  %v522_v48 = vadd.f32 %v521_v44, %v484_v40 }
 0x16e   : > { %v544_v49 = vadd.f32 %v543_v47, %v537_v45  ;;  %v523_v51 = vadd.f32 %v779_v39, %v522_v48 }
 0x170   : > { %v545_v53 = vadd.f32 %v544_v49, %v538_v50 }
 0x175   : > { %v782_v42 = vpop.f32.mrf.mxu1 }
 0x176   : > { %518 = vst [vmem:[%s1215_s11 + $0x28] sm:$0xff] %v782_v42  ;;  %v540_v57 = vmul.f32 %v782_v42, %v782_v42 }
 0x177   : > { %v494_v46 = vpop.f32.mrf.mxu1 }
 0x178   : > { %517 = vst [vmem:[%s1215_s11 + $0x20] sm:$0xff] %v494_v46  ;;  %v539_v52 = vmul.f32 %v494_v46, %v494_v46  ;;  %v524_v54 = vadd.f32 %v523_v51, %v494_v46 }
 0x17a   : > { %v546_v55 = vadd.f32 %v545_v53, %v539_v52  ;;  %v525_v58 = vadd.f32 %v782_v42, %v524_v54 }
 0x17c   : > { %v547_v62 = vadd.f32 %v546_v55, %v540_v57 }
 0x181   : > { %v785_v56 = vpop.f32.mrf.mxu1 }
 0x182   : > { %520 = vst [vmem:[%s1215_s11 + $0x38] sm:$0xff] %v785_v56 }
 0x183   : > { %v504_v59 = vpop.f32.mrf.mxu1 }
 0x184   : > { %519 = vst [vmem:[%s1215_s11 + $0x30] sm:$0xff] %v504_v59  ;;  %v526_v60 = vadd.f32 %v525_v58, %v504_v59  ;;  %v541_v61 = vmul.f32 %v504_v59, %v504_v59 }
 0x185   : > { %870 = shalt.err (!%p867_p3)
}
 0x186   : > { %s871_s6 = scalar_lea.hbm %s1228_s23, 1024  ;;  %s875_s10 = scalar_lea.hbm %s1344_s2, 2048 }
 0x187   : > { %p872_p4 = scmp.ne.s32.totalorder %s1228_s23, %s871_s6  ;;  %p876_p9 = scmp.lt.s32.totalorder %s1228_s23, %s1344_s2 }
 0x188   : > { %p877_p10 = scmp.lt.s32.totalorder %s875_s10, %s871_s6 }
 0x189   : > { %p873_p7 = pnand %p872_p4, %p1048_p5 }
 0x18a   : > { %p878_p11 = por %p877_p10, %p876_p9 }
 0x18b   : > { %p874_p8 = pneg %p873_p7 }
 0x18d   : > { %p879_p12 = pnand %p878_p11, %p874_p8 }
 0x18f   : > { %882 = shalt.err (!%p879_p12)
}
 0x190   : > { %s979_s14 = smov 128   ;;  %s980_s22 = smov 8   ;;  %v542_v63 = vmul.f32 %v785_v56, %v785_v56  ;;  %v527_v0 = vadd.f32 %v785_v56, %v526_v60  ;;  %v548_v1 = vadd.f32 %v547_v62, %v541_v61 }
 0x191   : > { %803 = dma.vmem_to_hbm [thread:$0]  (%p1048_p5), %s1230_s13, 1024, %s1228_s23, %s558_s27, %s979_s14, %s979_s14, %s980_s22  }
 0x192   : > { %v528_v2 = vrot.slane %v527_v0, 4  ;;  %v549_v3 = vadd.f32 %v548_v1, %v542_v63  ;;  %s562_s28 = sand.u32 1, %s1029_s19   ;;  %s737_s29 = sshll.u32 %s1029_s19, 4 }
 0x193   : > { %s200_s30 = scalar_lea.vmem [#allocation4], %s1212_s9  ;;  %s206_s13 = scalar_lea.vmem [#allocation6], %s1212_s9 }
 0x194   : > { %v529_v4 = vadd.f32 %v528_v2, %v527_v0  ;;  %v550_v5 = vrot.slane %v549_v3, 4  ;;  %s595_s5 = sshll.u32 %s200_s30, 4  ;;  %s608_s23 = sshll.u32 %s206_s13, 4  ;;  %s1268_s5 = int_to_ptr.vmem [resolvable:$true] %s595_s5  ;;  %s1275_s23 = int_to_ptr.vmem [resolvable:$true] %s608_s23 }
 0x195   : > { %s1266_s7 = scalar_lea.hbm %s1345_s3, %s737_s29  ;;  %s1273_s10 = scalar_lea.hbm %s1346_s4, %s737_s29 }
 0x196   : > { %v530_v6 = vrot.slane %v529_v4, 2  ;;  %v551_v7 = vadd.f32 %v550_v5, %v549_v3  ;;  %s1277_s11 = scalar_lea.sflag [#allocation5], %s562_s28  ;;  %s883_s12 = scalar_lea.vmem %s1268_s5, 16 }
 0x197   : > { %p884_p13 = scmp.ne.s32.totalorder %s1268_s5, %s883_s12  ;;  %s981_s14 = smov [#allocation4]  }
 0x198   : > { %v552_v8 = vrot.slane %v551_v7, 2  ;;  %v531_v9 = vadd.f32 %v530_v6, %v529_v4  ;;  %s887_s22 = sshll.u32 %s981_s14, 4  ;;  %s888_s22 = int_to_ptr.vmem [resolvable:$false] %s887_s22 }
 0x199   : > { %p885_p0 = pnand %p884_p13, %p1048_p5  ;;  %s889_s27 = scalar_lea.vmem %s888_s22, 32 }
 0x19a   : > { %v532_v10 = vrot.slane %v531_v9, 1  ;;  %v553_v11 = vadd.f32 %v552_v8, %v551_v7  ;;  %p890_p2 = scmp.lt.s32.totalorder %s1268_s5, %s888_s22  ;;  %p891_p3 = scmp.lt.s32.totalorder %s889_s27, %s883_s12 }
 0x19b   : > { %p886_p1 = pneg %p885_p0 }
 0x19c   : > { %v533_v13 = vadd.f32 %v532_v10, %v531_v9  ;;  %v554_v14 = vrot.slane %v553_v11, 1  ;;  %p892_p4 = por %p891_p3, %p890_p2 }
 0x19e   : > { %534 = vst [vmem:[%s200_s30] sm:$0x1] %v533_v13  ;;  %v555_v15 = vadd.f32 %v554_v14, %v553_v11  ;;  %p893_p7 = pnand %p892_p4, %p886_p1 }
 0x1a0   : > { %896 = shalt.err (!%p893_p7)
}
 0x1a1   : > { %s897_s28 = scalar_lea.hbm %s1266_s7, 16  ;;  %s901_s6 = scalar_lea.hbm %s1345_s3, 32 }
 0x1a2   : > { %p898_p8 = scmp.ne.s32.totalorder %s1266_s7, %s897_s28  ;;  %p902_p11 = scmp.lt.s32.totalorder %s1266_s7, %s1345_s3 }
 0x1a3   : > { %p903_p12 = scmp.lt.s32.totalorder %s901_s6, %s897_s28 }
 0x1a4   : > { %p899_p9 = pnand %p898_p8, %p1048_p5 }
 0x1a5   : > { %p904_p13 = por %p903_p12, %p902_p11 }
 0x1a6   : > { %p900_p10 = pneg %p899_p9 }
 0x1a8   : > { %p905_p0 = pnand %p904_p13, %p900_p10 }
 0x1aa   : > { %908 = shalt.err (!%p905_p0)
}
 0x1ab   : > { %804 = dma.vmem_to_hbm [thread:$0]  (%p1048_p5), %s1268_s5, 16, %s1266_s7, %s1277_s11   ;;  %556 = vst [vmem:[%s206_s13] sm:$0x1] %v555_v15 }
 0x1ac   : > { %s909_s12 = scalar_lea.vmem %s1275_s23, 16  ;;  %s982_s14 = smov [#allocation6]  }
 0x1ad   : > { %p910_p1 = scmp.ne.s32.totalorder %s1275_s23, %s909_s12  ;;  %s913_s22 = sshll.u32 %s982_s14, 4  ;;  %s914_s22 = int_to_ptr.vmem [resolvable:$false] %s913_s22 }
 0x1ae   : > { %s915_s27 = scalar_lea.vmem %s914_s22, 32  ;;  %p916_p4 = scmp.lt.s32.totalorder %s1275_s23, %s914_s22 }
 0x1af   : > { %p911_p2 = pnand %p910_p1, %p1048_p5  ;;  %p917_p7 = scmp.lt.s32.totalorder %s915_s27, %s909_s12 }
 0x1b1   : > { %p912_p3 = pneg %p911_p2  ;;  %p918_p8 = por %p917_p7, %p916_p4 }
 0x1b3   : > { %p919_p9 = pnand %p918_p8, %p912_p3 }
 0x1b5   : > { %922 = shalt.err (!%p919_p9)
}
 0x1b6   : > { %s923_s9 = scalar_lea.hbm %s1273_s10, 16  ;;  %s927_s7 = scalar_lea.hbm %s1346_s4, 32 }
 0x1b7   : > { %p924_p10 = scmp.ne.s32.totalorder %s1273_s10, %s923_s9  ;;  %p928_p13 = scmp.lt.s32.totalorder %s1273_s10, %s1346_s4 }
 0x1b8   : > { %p929_p0 = scmp.lt.s32.totalorder %s927_s7, %s923_s9 }
 0x1b9   : > { %p925_p11 = pnand %p924_p10, %p1048_p5 }
 0x1ba   : > { %p930_p1 = por %p929_p0, %p928_p13 }
 0x1bb   : > { %p926_p12 = pneg %p925_p11 }
 0x1bd   : > { %p931_p2 = pnand %p930_p1, %p926_p12 }
 0x1bf   : > { %934 = shalt.err (!%p931_p2)
}
 0x1c0   : > { %805 = dma.vmem_to_hbm [thread:$0]  (%p1048_p5), %s1275_s23, 16, %s1273_s10, %s1277_s11  }
 0x1c1 PF: > { %p819_p3 = scmp.ge.s32.totalorder %s973_s18, 2  ;;  %s620_s30 = sand.u32 1, %s961_s15  }
 0x1c2   : > { %s621_s6 = scalar_lea.sflag [#allocation3], %s620_s30 }
 0x1c3   : > { %p810_p4 = pnand %p819_p3, %p1052_p6 }
 0x1c5   : > { %p811_p7 = pneg %p810_p4 }
 0x1c7   : > { %952 = dma.done.wait (%p811_p7), %s621_s6, 1024  }
 0x1c8   : > { %954 = vsyncadd (%p811_p7), %s621_s6, 4294966272  ;;  %s629_s19 = sand.u32 1, %s720_s20  }
 0x1c9   : > { %s630_s25 = scalar_lea.sflag [#allocation5], %s629_s19 }
 0x1ca   : > { %956 = dma.done.wait (%p811_p7), %s630_s25, 32  }
 0x1cb   : > { %958 = vsyncadd (%p811_p7), %s630_s25, 4294967264  ;;  %p18_p5 = scmp.ge.s32.totalorder %s1033_s21, 4   ;;  %s1349_s15 = smov %s965_s16 }
 0x1cc   : > { %s1350_s16 = smov %s969_s17  ;;  %s1351_s17 = smov %s1046_s24 }
 0x1cd   : > { %s1352_s18 = smov %s1033_s21  ;;  %20 = sbr.rel (!%p18_p5) target bundleno = 5 (0x5), region = 95 }
 0x1d2   :  { %642 = vsyncpa [#allocation3], 1 }
 0x1d3   :  { %644 = vsyncpa [#allocation3 + $0x1], 1 }
 0x1d4   :  { %645 = vsyncpa [#allocation5], 1 }
 0x1d5   :  { %647 = vsyncpa [#allocation5 + $0x1], 1 }

</bundles_post_ra>
